<compile_context>
chip_gen: v7x
topology: tpu7x:2x2x1
jax: 0.10.0
libtpu: 0.0.40
codegen_flags: <defaults>
</compile_context>

<pallas_src>
import jax
import jax.numpy as jnp
from jax.experimental import pallas as pl
from jax.experimental.pallas import tpu as pltpu

_LN_EPS = 1e-5


# ----------------------------- kernel -------------------------------------- #

def _linear_ln_relu_kernel(x_ref, w_ref, b_ref, o_ref, acc_ref):
    """One (batch-tile, K-tile) grid step of Linear -> LayerNorm(no affine) -> ReLU."""
    k = pl.program_id(1)

    @pl.when(k == 0)
    def _():
        acc_ref[...] = jnp.zeros_like(acc_ref)

    # bf16 operands on the MXU, f32 accumulation.
    acc_ref[...] += jnp.dot(
        x_ref[...].astype(jnp.bfloat16),
        w_ref[...],
        preferred_element_type=jnp.float32,
    )

    @pl.when(k == pl.num_programs(1) - 1)
    def _():
        h = acc_ref[...] + b_ref[...]
        # Two-pass LayerNorm statistics (numerically safe vs E[h^2]-E[h]^2).
        mean = jnp.mean(h, axis=-1, keepdims=True)
        c = h - mean
        var = jnp.mean(c * c, axis=-1, keepdims=True)
        hn = c * jax.lax.rsqrt(var + _LN_EPS)
        o_ref[...] = jnp.maximum(hn, 0.0).astype(o_ref.dtype)


# ----------------------------- tiling heuristics ---------------------------- #

def _round_up(x, m):
    return ((x + m - 1) // m) * m


def _pick_batch_tile(batch, block_b):
    """Largest batch tile (multiple of 8) <= block_b, but keep >= 2 tiles when possible
    so v7x's two TensorCores both get work (harmless on 1-TC v5e/v6e)."""
    if batch <= 8:
        return batch                      # single full-extent block
    tb = min(block_b, _round_up(batch, 8))
    if pl.cdiv(batch, tb) < 2:
        tb = max(8, _round_up(pl.cdiv(batch, 2), 8))
    return tb


def _pick_k_tile(in_dim, out_dim, w_bytes_per_elem, budget_bytes=16 << 20):
    """Whole-W-resident when it fits a conservative VMEM budget, else tile in_dim in
    exact multiples of 128 (K tiles must not be ragged: garbage K-padding would be summed
    into the accumulator)."""
    if in_dim * out_dim * w_bytes_per_elem <= budget_bytes or in_dim % 128 != 0:
        return in_dim
    tk = max(128, ((budget_bytes // (out_dim * w_bytes_per_elem)) // 128) * 128)
    tk = min(tk, in_dim)
    while in_dim % tk != 0:
        tk -= 128
    return max(tk, 128)


# ----------------------------- wrapper -------------------------------------- #

def linear_ln_relu(x, w, b, *, block_b=256, out_dtype=jnp.float32):
    """Fused LinearReLU forward: ReLU(LayerNorm(x @ w + b)).

    x: [B, in_dim] f32
    w: [in_dim, out_dim]  (PyTorch weight transposed; cast to bf16 for the MXU)
    b: [1, out_dim] f32
    """
    B, in_dim = x.shape
    out_dim = w.shape[1]

    w = w.astype(jnp.bfloat16)            # bf16 MXU operand; halves weight DMA bytes
    b = b.astype(jnp.float32)

    tb = _pick_batch_tile(B, block_b)
    tk = _pick_k_tile(in_dim, out_dim, 2)
    num_b = pl.cdiv(B, tb)                # ragged last batch tile: masked stores, no pad
    num_k = in_dim // tk

    x_spec = pl.BlockSpec((tb, tk), lambda i, k: (i, k))
    if num_k == 1:
        # Whole W resident and constant across the grid: single-buffer it (and the bias)
        # to halve their VMEM footprint — key on v7x's 64 MiB/TC.
        w_spec = pl.BlockSpec((tk, out_dim), lambda i, k: (0, 0),
                              pipeline_mode=pl.Buffered(1))
    else:
        w_spec = pl.BlockSpec((tk, out_dim), lambda i, k: (k, 0))
    b_spec = pl.BlockSpec((1, out_dim), lambda i, k: (0, 0),
                          pipeline_mode=pl.Buffered(1))
    o_spec = pl.BlockSpec((tb, out_dim), lambda i, k: (i, 0))

    # Explicit VMEM budget (v7x default scoped limit is 32 MiB of 64 MiB physical).
    est = (2 * tb * tk * 4                                    # x tiles (f32, double-buffered)
           + (1 if num_k == 1 else 2) * tk * out_dim * 2      # W tiles (bf16)
           + out_dim * 4                                      # bias
           + 2 * tb * out_dim * 4                             # out tiles (double-buffered)
           + tb * out_dim * 4)                                # f32 accumulator scratch
    vmem_limit = int(min(max(2 * est, 32 << 20), 64 << 20))

    return pl.pallas_call(
        _linear_ln_relu_kernel,
        out_shape=jax.ShapeDtypeStruct((B, out_dim), out_dtype),
        grid_spec=pltpu.PrefetchScalarGridSpec(
            num_scalar_prefetch=0,
            grid=(num_b, num_k),
            in_specs=[x_spec, w_spec, b_spec],
            out_specs=o_spec,
            scratch_shapes=[pltpu.VMEM((tb, out_dim), jnp.float32)],
        ),
        compiler_params=pltpu.CompilerParams(
            dimension_semantics=("parallel", "arbitrary"),
            vmem_limit_bytes=vmem_limit,
        ),
    )(x, w, b)


# ----------------------------- parameter init ------------------------------- #

def init_linear_params(key, in_dim, out_dim):
    """Deterministic, PyTorch-Linear-like init. Weight stored as [in, out]."""
    kw, kb = jax.random.split(key)
    bound = 1.0 / jnp.sqrt(jnp.float32(in_dim))
    w = jax.random.uniform(kw, (in_dim, out_dim), jnp.float32, -bound, bound)
    b = jax.random.uniform(kb, (1, out_dim), jnp.float32, -bound, bound)
    return w, b


# ----------------------------- main ----------------------------------------- #

if __name__ == "__main__":
    input_dim, output_dim = 32, 32
    batch = 16

    key = jax.random.PRNGKey(0)
    k_params, k_x = jax.random.split(key)

    w, b = init_linear_params(k_params, input_dim, output_dim)
    x = jax.random.normal(k_x, (batch, input_dim), jnp.float32)

    out = linear_ln_relu(x, w, b)          # tb=8 -> 2 batch tiles, K resident
    jax.block_until_ready(out)

    # Pure-JAX reference (matches PyTorch: Linear -> LayerNorm(no affine) -> ReLU)
    def ref_forward(x, w, b):
        h = x @ w + b
        m = h.mean(-1, keepdims=True)
        v = ((h - m) ** 2).mean(-1, keepdims=True)
        return jnp.maximum((h - m) / jnp.sqrt(v + _LN_EPS), 0.0)

    ref = ref_forward(x, w, b)
    assert out.shape == (batch, output_dim)
    # bf16 MXU operands (f32 accumulate/epilogue) -> slightly looser tolerance than f32.
    assert jnp.allclose(out, ref, atol=2e-2), "LinearReLU output mismatch"

    print("KERNEL_OK")
</pallas_src>

<mosaic_0001>
module attributes {stable_mosaic.version = 11 : i64} {
  func.func @_linear_ln_relu_kernel(%arg0: i32, %arg1: i32, %arg2: memref<8x32xf32, #tpu.memory_space<vmem>>, %arg3: memref<32x32xbf16, #tpu.memory_space<vmem>>, %arg4: memref<1x32xf32, #tpu.memory_space<vmem>>, %arg5: memref<8x32xf32, #tpu.memory_space<vmem>>, %arg6: memref<8x32xf32, #tpu.memory_space<vmem>>) attributes {dimension_semantics = [#tpu.dimension_semantics<parallel>, #tpu.dimension_semantics<arbitrary>], iteration_bounds = array<i64: 2, 1>, scalar_prefetch = 0 : i64, scratch_operands = 1 : i64, tpu.core_type = #tpu.core_type<tc>, window_params = [{transform_indices = @transform_0, window_bounds = array<i64: 8, 32>}, {pipeline_mode = #tpu.pipeline_mode<synchronous>, transform_indices = @transform_1, window_bounds = array<i64: 32, 32>}, {pipeline_mode = #tpu.pipeline_mode<synchronous>, transform_indices = @transform_2, window_bounds = array<i64: 1, 32>}, {transform_indices = @transform_3, window_bounds = array<i64: 8, 32>}]} {
    %c0_i32 = arith.constant 0 : i32
    %0 = arith.cmpi eq, %arg1, %c0_i32 : i32
    %1 = arith.extui %0 : i1 to i32
    %c0_i32_0 = arith.constant 0 : i32
    %2 = arith.cmpi ne, %1, %c0_i32_0 : i32
    scf.if %2 {
      %cst_10 = arith.constant 0.000000e+00 : f32
      %13 = vector.broadcast %cst_10 : f32 to vector<8x32xf32>
      %c0_11 = arith.constant 0 : index
      %c0_12 = arith.constant 0 : index
      %14 = vector.load %arg6[%c0_11, %c0_12] : memref<8x32xf32, #tpu.memory_space<vmem>>, vector<8x32xf32>
      tpu.vector_store %arg6[%c0_11, %c0_12], %13 {strides = array<i32>} : memref<8x32xf32, #tpu.memory_space<vmem>>, vector<8x32xf32>,
    } else {
    }
    %c0 = arith.constant 0 : index
    %c0_1 = arith.constant 0 : index
    %3 = vector.load %arg6[%c0, %c0_1] : memref<8x32xf32, #tpu.memory_space<vmem>>, vector<8x32xf32>
    %c0_2 = arith.constant 0 : index
    %c0_3 = arith.constant 0 : index
    %4 = vector.load %arg2[%c0_2, %c0_3] : memref<8x32xf32, #tpu.memory_space<vmem>>, vector<8x32xf32>
    %5 = arith.truncf %4 : vector<8x32xf32> to vector<8x32xbf16>
    %c0_4 = arith.constant 0 : index
    %c0_5 = arith.constant 0 : index
    %6 = vector.load %arg3[%c0_4, %c0_5] : memref<32x32xbf16, #tpu.memory_space<vmem>>, vector<32x32xbf16>
    %cst = arith.constant dense<0.000000e+00> : vector<8x32xf32>
    %7 = tpu.matmul %5, %6, %cst {dimension_numbers = #tpu.dot_dimension_numbers<[1], [0], [0], [1], [0, 0, 1, 1], [], []>} : vector<8x32xbf16>, vector<32x32xbf16>, vector<8x32xf32> -> vector<8x32xf32>
    %8 = arith.addf %3, %7 : vector<8x32xf32>
    %c0_6 = arith.constant 0 : index
    %c0_7 = arith.constant 0 : index
    %9 = vector.load %arg6[%c0_6, %c0_7] : memref<8x32xf32, #tpu.memory_space<vmem>>, vector<8x32xf32>
    tpu.vector_store %arg6[%c0_6, %c0_7], %8 {strides = array<i32>} : memref<8x32xf32, #tpu.memory_space<vmem>>, vector<8x32xf32>,
    %c0_i32_8 = arith.constant 0 : i32
    %10 = arith.cmpi eq, %arg1, %c0_i32_8 : i32
    %11 = arith.extui %10 : i1 to i32
    %c0_i32_9 = arith.constant 0 : i32
    %12 = arith.cmpi ne, %11, %c0_i32_9 : i32
    scf.if %12 {
      %c0_10 = arith.constant 0 : index
      %c0_11 = arith.constant 0 : index
      %13 = vector.load %arg6[%c0_10, %c0_11] : memref<8x32xf32, #tpu.memory_space<vmem>>, vector<8x32xf32>
      %c0_12 = arith.constant 0 : index
      %c0_13 = arith.constant 0 : index
      %14 = vector.load %arg4[%c0_12, %c0_13] : memref<1x32xf32, #tpu.memory_space<vmem>>, vector<1x32xf32>
      %15 = vector.broadcast %14 : vector<1x32xf32> to vector<8x32xf32>
      %16 = arith.addf %13, %15 : vector<8x32xf32>
      %cst_14 = arith.constant dense<0.000000e+00> : vector<8xf32>
      %17 = vector.multi_reduction <add>, %16, %cst_14 [1] : vector<8x32xf32> to vector<8xf32>
      %18 = vector.shape_cast %17 : vector<8xf32> to vector<8x1xf32>
      %cst_15 = arith.constant 3.200000e+01 : f32
      %19 = vector.broadcast %cst_15 : f32 to vector<8x1xf32>
      %20 = arith.divf %18, %19 : vector<8x1xf32>
      %21 = vector.broadcast %20 : vector<8x1xf32> to vector<8x32xf32>
      %22 = arith.subf %16, %21 : vector<8x32xf32>
      %23 = arith.mulf %22, %22 : vector<8x32xf32>
      %cst_16 = arith.constant dense<0.000000e+00> : vector<8xf32>
      %24 = vector.multi_reduction <add>, %23, %cst_16 [1] : vector<8x32xf32> to vector<8xf32>
      %25 = vector.shape_cast %24 : vector<8xf32> to vector<8x1xf32>
      %cst_17 = arith.constant 3.200000e+01 : f32
      %26 = vector.broadcast %cst_17 : f32 to vector<8x1xf32>
      %27 = arith.divf %25, %26 : vector<8x1xf32>
      %cst_18 = arith.constant 9.99999974E-6 : f32
      %28 = vector.broadcast %cst_18 : f32 to vector<8x1xf32>
      %29 = arith.addf %27, %28 : vector<8x1xf32>
      %30 = math.rsqrt %29 : vector<8x1xf32>
      %31 = vector.broadcast %30 : vector<8x1xf32> to vector<8x32xf32>
      %32 = arith.mulf %22, %31 : vector<8x32xf32>
      %cst_19 = arith.constant 0.000000e+00 : f32
      %33 = vector.broadcast %cst_19 : f32 to vector<8x32xf32>
      %34 = arith.maximumf %32, %33 : vector<8x32xf32>
      %c0_20 = arith.constant 0 : index
      %c0_21 = arith.constant 0 : index
      %35 = vector.load %arg5[%c0_20, %c0_21] : memref<8x32xf32, #tpu.memory_space<vmem>>, vector<8x32xf32>
      tpu.vector_store %arg5[%c0_20, %c0_21], %34 {strides = array<i32>} : memref<8x32xf32, #tpu.memory_space<vmem>>, vector<8x32xf32>,
    } else {
    }
    return
  }
  func.func @transform_0(%arg0: i32, %arg1: i32) -> (i32, i32) {
    %c0_i32 = arith.constant 0 : i32
    return %arg0, %arg1 : i32, i32
  }
  func.func @transform_1(%arg0: i32, %arg1: i32) -> (i32, i32) {
    %c0_i32 = arith.constant 0 : i32
    %c0_i32_0 = arith.constant 0 : i32
    %c0_i32_1 = arith.constant 0 : i32
    return %c0_i32, %c0_i32_0 : i32, i32
  }
  func.func @transform_2(%arg0: i32, %arg1: i32) -> (i32, i32) {
    %c0_i32 = arith.constant 0 : i32
    %c0_i32_0 = arith.constant 0 : i32
    %c0_i32_1 = arith.constant 0 : i32
    return %c0_i32, %c0_i32_0 : i32, i32
  }
  func.func @transform_3(%arg0: i32, %arg1: i32) -> (i32, i32) {
    %c0_i32 = arith.constant 0 : i32
    %c0_i32_0 = arith.constant 0 : i32
    return %arg0, %c0_i32 : i32, i32
  }
}

</mosaic_0001>

<bundles_post_ra>
// kernel: tpu_custom_call.1
= control target key start
LH: loop header
LB: loop body
LE: loop exit
PB: predicated region body
PF: predicated region fallthrough
CT: control target
= control target key end

     0   :  { %8 = vsyncpa [#allocation4], 0  ;;  %s930_s0 = inlined_call_operand.hbm [shape: f32[16,32], index: 0, kind: input, shape index: {}]   ;;  %s931_s1 = inlined_call_operand.hbm [shape: bf16[32,32], index: 1, kind: input, shape index: {}]   ;;  %s932_s2 = inlined_call_operand.vmem [shape: f32[1,32], index: 2, kind: input, shape index: {}]   ;;  %s933_s3 = inlined_call_operand.hbm [shape: f32[16,32], index: 3, kind: output, shape index: {}]  }
   0x1   :  { %10 = vsyncpa [#allocation4 + $0x1], 0 }
   0x2   :  { %11 = vsyncpa [#allocation7], 0 }
   0x3   :  { %12 = vsyncpa [#allocation5], 0 }
   0x4   :  { %14 = vsyncpa [#allocation5 + $0x1], 0  ;;  %s703_s12 = smov 0   ;;  %s705_s13 = smov 0  }
   0x5   :  { %s707_s14 = smov 0   ;;  %s709_s15 = smov 0  }
   0x6   :  { %s711_s16 = smov 0   ;;  %s713_s17 = smov 0  }
   0x7 LB: > { %s419_s18 = sadd.s32 4294967295, %s674_s17   ;;  %s420_s19 = sadd.s32 4294967294, %s674_s17   ;;  %s674_s17 = sphi %s713_s17, %s20_s17   ;;  %s670_s16 = sphi %s711_s16, %s957_s16   ;;  %s666_s15 = sphi %s709_s15, %s956_s15   ;;  %s662_s14 = sphi %s707_s14, %s955_s14   ;;  %s658_s13 = sphi %s705_s13, %s954_s13   ;;  %s654_s12 = sphi %s703_s12, %s953_s12  }
   0x8   : > { %p54_p0 = scmp.ne.s32.totalorder %s658_s13, %s654_s12  ;;  %p737_p1 = scmp.eq.s32.totalorder %s419_s18, 0 }
   0x9   : > { %p741_p2 = scmp.eq.s32.totalorder %s419_s18, 1  ;;  %p126_p3 = scmp.eq.s32.totalorder %s420_s19, 1 }
   0xa   : > { %s938_s20 = scalar_select %p737_p1, 1, 0 }
   0xb   : > { %s939_s21 = scalar_select %p741_p2, 1, 0 }
   0xc   : > { %p747_p4 = por %p737_p1, %p54_p0  ;;  %p421_p5 = scmp.ge.s32.totalorder %s674_s17, 1 }
   0xd   : > { %p752_p6 = por %p126_p3, %p54_p0  ;;  %p133_p7 = scmp.lt.s32.totalorder %s674_s17, 3 }
   0xe   : > { %s940_s22 = scalar_select %p747_p4, 1, 0 }
   0xf   : > { %s941_s23 = scalar_select %p752_p6, 1, 0 }
  0x10   : > { %p757_p8 = pnand %p421_p5, %p133_p7  ;;  %s676_s25 = smov [#allocation6]  }
  0x11   : > { %s145_s26 = sshll.u32 %s676_s25, 4  ;;  %s32_s28 = sadd.s32 1, %s670_s16  ;;  %s146_s26 = int_to_ptr.vmem [resolvable:$true] %s145_s26 }
  0x12   : > { %s942_s24 = scalar_select %p757_p8, 1, 0 }
  0x13   : > { %p457_p9 = pneg %p757_p8  ;;  %s530_s4 = scalar_lea.hbm %s931_s1, 256 }
  0x14   : > { %p531_p12 = scmp.ne.s32.totalorder %s931_s1, %s530_s4  ;;  %p537_p5 = scmp.lt.u32.totalorder %s530_s4, %s931_s1 }
  0x15   : > { %p766_p11 = pnand %p457_p9, %p737_p1 }
  0x17   : > { %p532_p13 = pneg %p766_p11 }
  0x19   : > { %p533_p0 = pnand %p532_p13, %p531_p12 }
  0x1b   : > { %p534_p3 = pneg %p533_p0 }
  0x1d   : > { %p539_p7 = pnand %p537_p5, %p534_p3 }
  0x1f   : > { %542 = shalt.err (!%p539_p7)
}
  0x20   : > { %s543_s9 = scalar_lea.vmem %s146_s26, 256  ;;  %p551_p1 = scmp.lt.s32.totalorder %s146_s26, %s146_s26 }
  0x21   : > { %p544_p9 = scmp.ne.s32.totalorder %s146_s26, %s543_s9  ;;  %p552_p4 = scmp.lt.s32.totalorder %s543_s9, %s543_s9 }
  0x23   : > { %p546_p10 = pnand %p544_p9, %p532_p13  ;;  %p553_p8 = por %p552_p4, %p551_p1 }
  0x25   : > { %p547_p6 = pneg %p546_p10 }
  0x27   : > { %p554_p2 = pnand %p553_p8, %p547_p6 }
  0x29   : > { %557 = shalt.err (!%p554_p2)
}
  0x2a   : > { %s677_s10 = smov 64   ;;  %s678_s11 = smov 4  }
  0x2b   : > { %460 = dma.hbm_to_vmem [thread:$0]  (!%p766_p11), %s931_s1, 256, %s146_s26, [#allocation7], %s677_s10, %s677_s10, %s678_s11  }
  0x2c   : > { %p34_p1 = scmp.ge.s32.totalorder %s32_s28, 2  ;;  %s41_s25 = sadd.s32 1, %s662_s14 }
  0x2d   : > { %p48_p2 = scmp.ne.s32.totalorder %s662_s14, %s658_s13  ;;  %p49_p4 = scmp.eq.s32.totalorder %s674_s17, 0 }
  0x2e   : > { %s959_s28 = smov (%p34_p1, %s32_s28), 0  ;;  %p945_p8 = scmp.ne.s32.totalorder %s939_s21, 0 }
  0x2f   : > { %p793_p6 = por %p49_p4, %p48_p2  ;;  %s36_s27 = ssub.s32 %s670_s16, %s959_s28 }
  0x30   : > { %p799_p10 = por %p945_p8, %p48_p2  ;;  %p470_p12 = scmp.lt.s32.totalorder %s674_s17, 2 }
  0x31   : > { %p39_p11 = scmp.eq.s32.totalorder %s36_s27, 0  ;;  %s162_s26 = sand.u32 1, %s662_s14  }
  0x32   : > { %s424_s4 = sshll.u32 %s162_s26, 3  ;;  %s425_s6 = sshll.u32 %s670_s16, 7 }
  0x33   : > { %s808_s5 = scalar_select %p39_p11, %s662_s14, %s41_s25  }
  0x34   : > { %s814_s9 = scalar_lea.hbm %s930_s0, %s425_s6  ;;  %s166_s21 = scalar_lea.vmem [#allocation3], %s424_s4 }
  0x35   : > { %s174_s10 = sshll.u32 %s166_s21, 4  ;;  %p820_p13 = pnand %p470_p12, %p793_p6  ;;  %s816_s10 = int_to_ptr.vmem [resolvable:$true] %s174_s10 }
  0x36   : > { %s163_s18 = scalar_lea.sflag [#allocation4], %s162_s26  ;;  %s558_s19 = scalar_lea.hbm %s814_s9, 128 }
  0x37   : > { %p559_p0 = scmp.ne.s32.totalorder %s814_s9, %s558_s19  ;;  %p560_p3 = pneg %p820_p13 }
  0x38   : > { %s563_s4 = scalar_lea.hbm %s930_s0, 256  ;;  %p564_p9 = scmp.lt.u32.totalorder %s814_s9, %s930_s0 }
  0x39   : > { %p561_p5 = pnand %p560_p3, %p559_p0  ;;  %p565_p1 = scmp.lt.u32.totalorder %s563_s4, %s558_s19 }
  0x3a   : > { %p567_p4 = scmp.lt.u32.totalorder %s558_s19, %s814_s9 }
  0x3b   : > { %p562_p7 = pneg %p561_p5  ;;  %p566_p2 = por %p565_p1, %p564_p9 }
  0x3d   : > { %p568_p6 = por %p567_p4, %p566_p2 }
  0x3f   : > { %p569_p8 = pnand %p568_p6, %p562_p7 }
  0x41   : > { %572 = shalt.err (!%p569_p8)
}
  0x42   : > { %s573_s26 = scalar_lea.vmem %s816_s10, 128  ;;  %s679_s7 = smov [#allocation3]  }
  0x43   : > { %p574_p12 = scmp.ne.s32.totalorder %s816_s10, %s573_s26  ;;  %s578_s8 = sshll.u32 %s679_s7, 4  ;;  %s579_s8 = int_to_ptr.vmem [resolvable:$false] %s578_s8 }
  0x44   : > { %s580_s21 = scalar_lea.vmem %s579_s8, 256  ;;  %p581_p5 = scmp.lt.s32.totalorder %s816_s10, %s579_s8 }
  0x45   : > { %p576_p11 = pnand %p574_p12, %p560_p3  ;;  %p582_p9 = scmp.lt.s32.totalorder %s580_s21, %s573_s26 }
  0x47   : > { %p577_p0 = pneg %p576_p11  ;;  %p583_p1 = por %p582_p9, %p581_p5 }
  0x49   : > { %p584_p2 = pnand %p583_p1, %p577_p0 }
  0x4b   : > { %587 = shalt.err (!%p584_p2)
}
  0x4c   : > { %464 = dma.hbm_to_vmem [thread:$0]  (!%p820_p13), %s814_s9, 128, %s816_s10, %s163_s18  }
  0x4d   : > { %p948_p7 = scmp.ne.s32.totalorder %s942_s24, 0 }
  0x4e   : > { %s852_s19 = sand.u32 (!%p948_p7), 1, %s658_s13   ;;  %p949_p3 = scmp.ne.s32.totalorder (!%p948_p7), %s940_s22, 0 }
  0x4f   : > { %183 = sbr.rel (%p948_p7) target bundleno = 648 (0x288), region = 32  ;;  %s427_s25 = sshll.u32 (!%p948_p7), %s852_s19, 3 }
  0x50   : > { %s186_s27 = scalar_lea.sflag (!%p948_p7), [#allocation4], %s852_s19  ;;  %s189_s4 = scalar_lea.vmem (!%p948_p7), [#allocation3], %s427_s25 }
  0x56   : > { %641 = dma.done.wait (%p949_p3), %s186_s27, 128  }
  0x57   : > { %643 = vsyncadd (%p949_p3), %s186_s27, 4294967168  ;;  %p950_p13 = scmp.ne.s32.totalorder %s938_s20, 0 }
  0x59   : > { %645 = dma.done.wait (%p950_p13), [#allocation7], 256  }
  0x5a   : > { %647 = vsyncadd (%p950_p13), [#allocation7], 4294967040  ;;  %vm221_vm0 = vcmask 261120   ;;  %v680_v0 = vmov 0.0   ;;  %vm681_vm1 = vmmov 0   ;;  %v526_v1 = vld [vmem:[#allocation6] sm:$0xff]  }
  0x5b   : > { %222 = vst.msk [vmem:[#allocation2] sm:$0xff] %vm221_vm0, %v680_v0  ;;  %441 = vmatprep.subr.bf16.mxu0 %v680_v0  ;;  %445 = vmatprep.mubr.msk.bf16.mxu0 %vm681_vm1, %v680_v0  ;;  %v527_v2 = vld [vmem:[#allocation6 + $0x8] sm:$0xff]   ;;  %v224_v3 = vld [vmem:[%s189_s4] sm:$0xff]  ;;  %s435_s24 = sshll.u32 %s666_s15, 7  ;;  %s215_s9 = scalar_lea.vmem [#allocation8], %s427_s25 }
  0x5c   : > { %442 = vmatpush3.bf16.msra.mxu0 %v526_v1  ;;  %v225_v4 = vpack.c.bf16 %v224_v3, %v224_v3  ;;  %v433_v11 = vld [vmem:[%s932_s2] ss:$0 sm:$0xff]  ;;  %s330_s10 = sshll.u32 %s215_s9, 4  ;;  %s880_s29 = scalar_lea.hbm %s933_s3, %s435_s24  ;;  %s882_s10 = int_to_ptr.vmem [resolvable:$true] %s330_s10 }
  0x5d   : > { %443 = vmatprep.subr.bf16.mxu0 %v680_v0  ;;  %s317_s6 = scalar_lea.sflag [#allocation5], %s852_s19  ;;  %s588_s26 = scalar_lea.vmem %s882_s10, 128 }
  0x5e   : > { %p589_p4 = scmp.ne.s32.totalorder %s882_s10, %s588_s26  ;;  %s682_s15 = smov [#allocation8]  }
  0x5f   : > { %s592_s7 = sshll.u32 %s682_s15, 4  ;;  %s593_s7 = int_to_ptr.vmem [resolvable:$false] %s592_s7 }
  0x60   : > { %444 = vmatpush3.bf16.msra.mxu0 %v527_v2  ;;  %p590_p6 = pnand %p589_p4, %p799_p10  ;;  %s594_s8 = scalar_lea.vmem %s593_s7, 256 }
  0x61   : > { %p595_p12 = scmp.lt.s32.totalorder %s882_s10, %s593_s7  ;;  %p596_p11 = scmp.lt.s32.totalorder %s594_s8, %s588_s26 }
  0x62   : > { %v223_v5 = vld [vmem:[#allocation2] sm:$0xff]  ;;  %p591_p8 = pneg %p590_p6 }
  0x63   : > { %446 = vmatmul.mubr.msk.bf16.vlgmr.msra.gmra.mrb[0].mxu0 %vm221_vm0, %v225_v4  ;;  %p597_p0 = por %p596_p11, %p595_p12 }
  0x65   : > { %p598_p5 = pnand %p597_p0, %p591_p8 }
 0x136   : > { %v280_v6 = vpop.f32.mrb[0].mxu0 }
 0x137   : > { %v286_v7 = vadd.f32 %v280_v6, %v223_v5  ;;  %v447_v8 = vpop.f32.mrb[1].mxu0 }
 0x138   : > { %v283_v9 = vpop.f32.mrb[2].mxu0 }
 0x139   : > { %287 = vst.msk [vmem:[#allocation2] sm:$0xff] %vm221_vm0, %v286_v7  ;;  %v448_v10 = vpop.f32.mrb[3].mxu0 }
 0x140   : > { %v291_v12 = vld [vmem:[#allocation2] sm:$0xff] }
 0x141   : > { %v299_v13 = vadd.f32 %v433_v11, %v291_v12 }
 0x143   : > { %v300_v14 = vsel %vm221_vm0, %v299_v13, 0.0 }
 0x144   : > { %301 = vadd.xlane.f32.xlu0 %v300_v14 }
 0x1d1   : > { %v302_v15 = vpop.xlane.xlu0 %301 }
 0x1d2   : > { %v304_v16 = vmul.f32 0.03125, %v302_v15 }
 0x1d4   : > { %v305_v17 = vsub.f32 %v299_v13, %v304_v16 }
 0x1d6   : > { %v306_v18 = vmul.f32 %v305_v17, %v305_v17 }
 0x1d8   : > { %v307_v19 = vsel %vm221_vm0, %v306_v18, 0.0 }
 0x1d9   : > { %308 = vadd.xlane.f32.xlu0 %v307_v19 }
 0x266   : > { %v309_v20 = vpop.xlane.xlu0 %308 }
 0x267   : > { %v310_v21 = vmul.f32 0.03125, %v309_v20 }
 0x269   : > { %v311_v22 = vadd.f32 1e-05, %v310_v21 }
 0x26b   : > { %528 = vrsqrt.f32 %v311_v22 }
 0x275   : > { %v529_v23 = vpop.eup %528 }
 0x276   : > { %v313_v24 = vmul.f32 %v529_v23, %v305_v17 }
 0x278   : > { %v314_v25 = vmax.f32 %v313_v24, 0.0 }
 0x27a   : > { %315 = vst.msk [vmem:[%s215_s9] sm:$0xff] %vm221_vm0, %v314_v25 }
 0x27b   : > { %601 = shalt.err (!%p598_p5)
}
 0x27c   : > { %s602_s21 = scalar_lea.hbm %s880_s29, 128  ;;  %s606_s27 = scalar_lea.hbm %s933_s3, 256 }
 0x27d   : > { %p603_p9 = scmp.ne.s32.totalorder %s880_s29, %s602_s21  ;;  %p607_p7 = scmp.lt.u32.totalorder %s880_s29, %s933_s3 }
 0x27e   : > { %p608_p3 = scmp.lt.u32.totalorder %s606_s27, %s602_s21  ;;  %p610_p4 = scmp.lt.u32.totalorder %s602_s21, %s880_s29 }
 0x27f   : > { %p604_p1 = pnand %p603_p9, %p799_p10 }
 0x280   : > { %p609_p13 = por %p608_p3, %p607_p7 }
 0x281   : > { %p605_p2 = pneg %p604_p1 }
 0x282   : > { %p611_p6 = por %p610_p4, %p609_p13 }
 0x284   : > { %p612_p8 = pnand %p611_p6, %p605_p2 }
 0x286   : > { %615 = shalt.err (!%p612_p8)
}
 0x287   : > { %455 = dma.vmem_to_hbm [thread:$0]  (%p799_p10), %s882_s10, 128, %s880_s29, %s317_s6  }
 0x288 PF: > { %s342_s22 = sand.u32 1, %s654_s12   ;;  %p951_p12 = scmp.ne.s32.totalorder %s941_s23, 0 }
 0x289   : > { %p952_p11 = scmp.ge.s32.totalorder %s674_s17, 2  ;;  %s343_s24 = scalar_lea.sflag [#allocation5], %s342_s22 }
 0x28b   : > { %p466_p0 = pnand %p952_p11, %p951_p12 }
 0x28d   : > { %649 = dma.done.wait (!%p466_p0), %s343_s24, 128  }
 0x28e   : > { %651 = vsyncadd (!%p466_p0), %s343_s24, 4294967168  ;;  %s20_s17 = sadd.s32 1, %s674_s17   ;;  %s953_s12 = smov %s658_s13 }
 0x28f   : > { %p17_p5 = scmp.ge.s32.totalorder %s20_s17, 4   ;;  %s954_s13 = smov %s662_s14 }
 0x290   : > { %s955_s14 = smov %s808_s5  ;;  %s956_s15 = smov %s670_s16 }
 0x291   : > { %s957_s16 = smov %s959_s28  ;;  %19 = sbr.rel (!%p17_p5) target bundleno = 7 (0x7), region = 89 }
 0x298   :  { %348 = vsyncpa [#allocation4], 1 }
 0x299   :  { %350 = vsyncpa [#allocation4 + $0x1], 1 }
 0x29a   :  { %351 = vsyncpa [#allocation7], 1 }
 0x29b   :  { %352 = vsyncpa [#allocation5], 1 }
 0x29c   :  { %354 = vsyncpa [#allocation5 + $0x1], 1 }

</bundles_post_ra>
